<compile_context>
chip_gen: v7x
topology: tpu7x:2x2x1
jax: 0.10.0
libtpu: 0.0.40
codegen_flags: <defaults>
</compile_context>

<pallas_src>
import math

import jax
import jax.numpy as jnp
from jax import lax
from jax.experimental import pallas as pl
from jax.experimental.pallas import tpu as pltpu

BN_EPS = 1e-5
_TRANS_B_DIMS = (((1,), (1,)), ((), ()))   # x @ w1T.T  (rhs-transposed contraction)


def _round_up(a, b):
    return (a + b - 1) // b * b


def _vmem_limit_bytes():
    """Generation-aware scoped-VMEM limit (leaves ~25% headroom)."""
    cap = 0
    try:
        info = pltpu.get_tpu_info()
        for name in ("vmem_capacity_bytes", "vmem_size_bytes", "vmem_bytes"):
            v = getattr(info, name, None)
            if v:
                cap = int(v)
                break
    except Exception:
        cap = 0
    if cap <= 0:
        cap = 64 * 1024 * 1024          # conservative: smallest per-core VMEM (v7x)
    # never below v6e/v7x scoped default (32 MiB), never above 96 MiB even on
    # 128-MiB parts (compiler scratch / semaphores need room).
    return int(max(32 * 1024 * 1024, min(cap * 3 // 4, 96 * 1024 * 1024)))


def _pick_tk(K, B, U, c_pad, n_hidden, limit_bytes):
    """Largest K tile (multiple of 128 dividing K) such that the double-buffered
    (x, w1T) tiles PLUS the accumulator, output and small-param buffers fit the
    scoped-VMEM limit.  Returns K (grid of 1) whenever possible."""
    assert K % 128 == 0, "flattened input dim must be a multiple of 128"
    B16 = _round_up(B, 16)     # bf16 sublane packing of the x tile
    B8 = _round_up(B, 8)       # f32 sublane packing
    U16 = _round_up(U, 16)     # bf16 sublane packing of the (U, tk) w1T tile
    U128 = _round_up(U, 128)   # f32 lane padding of (.., U) arrays

    # VMEM cost that does not depend on tk (worst case: multi-step pipeline):
    fixed = B8 * U128 * 4                      # f32 accumulator scratch
    fixed += 2 * B8 * c_pad * 4                # double-buffered f32 output block
    small = n_hidden * (U16 * U128 * 2         # hidden weight (bf16)
                        + 2 * 8 * U128 * 4)    # gamma + beta (f32, (1,U))
    small += U16 * c_pad * 2                   # padded head weight (bf16)
    fixed += 2 * small                         # <=2 buffers each
    fixed += 2 * 1024 * 1024                   # compiler-internal headroom

    per_col = 2 * (B16 + U16) * 2              # double-buffered bf16 x + w1T per K column
    budget = limit_bytes - fixed
    max_cols = max(budget // per_col, 128)
    if max_cols >= K:
        return K                               # single grid step: no K pipelining
    n128 = K // 128
    m = max(min(int(max_cols) // 128, n128), 1)
    while m > 1 and n128 % m != 0:
        m -= 1
    return 128 * m


def _make_kernel(n_hidden, single_step):
    """Fused MLP kernel for `n_hidden` = n_layers-1 hidden (Linear+BN+ReLU) blocks."""

    def epilogue(h, hid_refs, wout_ref, o_ref):
        # Hidden blocks: Linear(bias=False) -> BatchNorm1d (batch statistics,
        # training-mode semantics, biased variance) -> ReLU, all VMEM-resident.
        for i in range(n_hidden):
            w_r, g_r, b_r = hid_refs[3 * i:3 * i + 3]
            z = jnp.dot(h.astype(jnp.bfloat16), w_r[...],
                        preferred_element_type=jnp.float32)
            mean = jnp.mean(z, axis=0, keepdims=True)
            var = jnp.mean((z - mean) ** 2, axis=0, keepdims=True)      # biased
            zhat = (z - mean) * lax.rsqrt(var + BN_EPS)
            h = jnp.maximum(zhat * g_r[...] + b_r[...], 0.0)
        # Output Linear (bias=False); columns zero-padded to 128 lanes so the
        # store is a full-lane unmasked vst.
        logits = jnp.dot(h.astype(jnp.bfloat16), wout_ref[...],
                         preferred_element_type=jnp.float32)
        o_ref[...] = logits.astype(o_ref.dtype)

    if single_step:
        def kernel(*refs):
            x_ref, w1t_ref = refs[0], refs[1]
            hid = refs[2:2 + 3 * n_hidden]
            wout_ref = refs[2 + 3 * n_hidden]
            o_ref = refs[3 + 3 * n_hidden]
            # First Linear: lane-dense transposed weight, f32 accumulation,
            # no scratch accumulator round-trips.
            h = jnp.maximum(
                lax.dot_general(x_ref[...], w1t_ref[...],
                                dimension_numbers=_TRANS_B_DIMS,
                                preferred_element_type=jnp.float32), 0.0)
            epilogue(h, hid, wout_ref, o_ref)
        return kernel

    def kernel(*refs):
        x_ref, w1t_ref = refs[0], refs[1]
        hid = refs[2:2 + 3 * n_hidden]
        wout_ref = refs[2 + 3 * n_hidden]
        o_ref = refs[3 + 3 * n_hidden]
        acc_ref = refs[4 + 3 * n_hidden]
        k = pl.program_id(0)

        @pl.when(k == 0)
        def _():
            acc_ref[...] = jnp.zeros_like(acc_ref)

        # First Linear (bias=False): K-tiled bf16 matmul, f32 accumulation.
        acc_ref[...] += lax.dot_general(x_ref[...], w1t_ref[...],
                                        dimension_numbers=_TRANS_B_DIMS,
                                        preferred_element_type=jnp.float32)

        @pl.when(k == pl.num_programs(0) - 1)
        def _():
            epilogue(jnp.maximum(acc_ref[...], 0.0), hid, wout_ref, o_ref)

    return kernel


def prepare_params(params):
    """ONE-TIME conversion of the f32 module parameters to kernel-ready layout:
    bf16 weights, w1 stored transposed (U, K) for a lane-dense dominant stream,
    head weight zero-padded to a multiple of 128 output columns."""
    w1 = params["w1"]                                  # (K, U) f32
    U = w1.shape[1]
    w_out = params["w_out"]                            # (U, n_classes) f32
    n_classes = w_out.shape[1]
    c_pad = _round_up(n_classes, 128)
    w_out_p = jnp.zeros((U, c_pad), jnp.bfloat16).at[:, :n_classes].set(
        w_out.astype(jnp.bfloat16))
    return {
        "w1T": jnp.asarray(w1.T, jnp.bfloat16),        # (U, K)
        "hidden": [(jnp.asarray(w, jnp.bfloat16),
                    jnp.asarray(g, jnp.float32),
                    jnp.asarray(b, jnp.float32)) for (w, g, b) in params["hidden"]],
        "w_out_p": w_out_p,
        "n_classes": n_classes,
    }


def mlp_forward(x_nchw, kp):
    """Pallas forward pass equivalent to MLP.forward(x). `kp` = prepare_params(...)."""
    B = x_nchw.shape[0]
    x = x_nchw.reshape(B, -1).astype(jnp.bfloat16)     # nn.Flatten + bf16 activation
    K = x.shape[1]
    w1t = kp["w1T"]
    U = w1t.shape[0]
    hidden = kp["hidden"]
    n_hidden = len(hidden)
    w_out_p = kp["w_out_p"]
    c_pad = w_out_p.shape[1]
    n_classes = kp["n_classes"]

    vmem_limit = _vmem_limit_bytes()
    tk = _pick_tk(K, B, U, c_pad, n_hidden, vmem_limit)
    grid_k = K // tk
    single_step = (grid_k == 1)

    inputs = [x, w1t]
    for (w, g, b) in hidden:
        inputs += [w, g, b]
    inputs.append(w_out_p)

    in_specs = [
        pl.BlockSpec((B, tk), lambda k: (0, k)),       # x   : K-tiled
        pl.BlockSpec((U, tk), lambda k: (0, k)),       # w1^T: K-tiled, lane-dense
    ]
    # Grid-invariant small params: full blocks; single-buffered when K is
    # actually pipelined (frees VMEM / DMA descriptors for the big K tile).
    small_kwargs = {} if single_step else {"pipeline_mode": pl.Buffered(1)}
    for arr in inputs[2:]:
        in_specs.append(pl.BlockSpec(arr.shape, lambda k: (0, 0), **small_kwargs))

    scratch = [] if single_step else [pltpu.VMEM((B, U), jnp.float32)]

    out_padded = pl.pallas_call(
        _make_kernel(n_hidden, single_step),
        out_shape=jax.ShapeDtypeStruct((B, c_pad), jnp.float32),
        grid_spec=pltpu.PrefetchScalarGridSpec(
            num_scalar_prefetch=0,
            grid=(grid_k,),
            in_specs=in_specs,
            out_specs=pl.BlockSpec((B, c_pad), lambda k: (0, 0)),
            scratch_shapes=scratch,
        ),
        compiler_params=pltpu.CompilerParams(
            dimension_semantics=("arbitrary",),
            vmem_limit_bytes=vmem_limit,
        ),
    )(*inputs)
    return out_padded[:, :n_classes]


def init_params(key, n_layers, n_units, n_channels, n_classes=10):
    """Deterministic synthetic f32 parameters matching the module's shapes
    (all Linear layers bias-free; BN gamma=1, beta=0).  Linears are stored
    transposed, (in_features, out_features), so y = x @ W matches torch x @ W.T."""
    d_in = 96 * 96 * n_channels
    n_hidden = n_layers - 1
    keys = jax.random.split(key, n_layers + 1)

    def lin(k, fan_in, fan_out):
        bound = 1.0 / math.sqrt(fan_in)
        return jax.random.uniform(k, (fan_in, fan_out), jnp.float32,
                                  minval=-bound, maxval=bound)

    params = {"w1": lin(keys[0], d_in, n_units)}
    hidden = []
    for i in range(n_hidden):
        hidden.append((lin(keys[1 + i], n_units, n_units),
                       jnp.ones((1, n_units), jnp.float32),     # BN gamma
                       jnp.zeros((1, n_units), jnp.float32)))   # BN beta
    params["hidden"] = hidden
    params["w_out"] = lin(keys[n_layers], n_units, n_classes)
    return params


def ref_forward_f32(x_nchw, params):
    """Pure-JAX f32 reference matching the PyTorch semantics (BN in train mode)."""
    x = x_nchw.reshape(x_nchw.shape[0], -1)
    h = jnp.maximum(x @ params["w1"], 0.0)
    for (w, g, b) in params["hidden"]:
        z = h @ w
        mean = jnp.mean(z, axis=0, keepdims=True)
        var = jnp.mean((z - mean) ** 2, axis=0, keepdims=True)
        h = jnp.maximum((z - mean) / jnp.sqrt(var + BN_EPS) * g + b, 0.0)
    return h @ params["w_out"]


def ref_forward_matched(x_nchw, params):
    """Pure-JAX reference with the SAME bf16 casts / f32 accumulation as the kernel."""
    x = x_nchw.reshape(x_nchw.shape[0], -1).astype(jnp.bfloat16)
    h = jnp.maximum(jnp.dot(x, params["w1"].astype(jnp.bfloat16),
                            preferred_element_type=jnp.float32), 0.0)
    for (w, g, b) in params["hidden"]:
        z = jnp.dot(h.astype(jnp.bfloat16), w.astype(jnp.bfloat16),
                    preferred_element_type=jnp.float32)
        mean = jnp.mean(z, axis=0, keepdims=True)
        var = jnp.mean((z - mean) ** 2, axis=0, keepdims=True)
        zhat = (z - mean) * lax.rsqrt(var + BN_EPS)
        h = jnp.maximum(zhat * g + b, 0.0)
    return jnp.dot(h.astype(jnp.bfloat16), params["w_out"].astype(jnp.bfloat16),
                   preferred_element_type=jnp.float32)


if __name__ == "__main__":
    # Small config: n_layers=2 (one Linear+BN+ReLU block), n_units=32,
    # n_channels=1 (input dim 96*96 = 9216), n_classes=10.
    # B=16: multiple of 16 for full bf16 sublane packing.  Note BN uses batch
    # statistics, so outputs depend on batch composition (training-mode BN).
    n_layers, n_units, n_channels, n_classes = 2, 32, 1, 10
    B = 16

    key = jax.random.PRNGKey(0)
    kx, kparam = jax.random.split(key)
    x = jax.random.normal(kx, (B, n_channels, 96, 96), jnp.float32)

    params = init_params(kparam, n_layers, n_units, n_channels, n_classes)
    kparams = jax.block_until_ready(prepare_params(params))   # one-time conversion

    out = mlp_forward(x, kparams)
    jax.block_until_ready(out)

    ref_m = ref_forward_matched(x, params)   # same precision recipe as kernel
    ref_f = ref_forward_f32(x, params)       # full-f32 PyTorch semantics

    assert out.shape == (B, n_classes)
    assert jnp.allclose(out, ref_m, atol=1e-2, rtol=1e-2), "mismatch vs bf16-matched reference"
    assert jnp.allclose(out, ref_f, atol=1e-1, rtol=1e-1), "mismatch vs f32 reference"

    print("KERNEL_OK")
</pallas_src>

<mosaic_0001>
module attributes {stable_mosaic.version = 11 : i64} {
  func.func @kernel(%arg0: i32, %arg1: memref<16x9216xbf16, #tpu.memory_space<vmem>>, %arg2: memref<32x9216xbf16, #tpu.memory_space<vmem>>, %arg3: memref<32x32xbf16, #tpu.memory_space<vmem>>, %arg4: memref<1x32xf32, #tpu.memory_space<vmem>>, %arg5: memref<1x32xf32, #tpu.memory_space<vmem>>, %arg6: memref<32x128xbf16, #tpu.memory_space<vmem>>, %arg7: memref<16x128xf32, #tpu.memory_space<vmem>>) attributes {dimension_semantics = [#tpu.dimension_semantics<arbitrary>], iteration_bounds = array<i64: 1>, scalar_prefetch = 0 : i64, scratch_operands = 0 : i64, tpu.core_type = #tpu.core_type<tc>, window_params = [{transform_indices = @transform_0, window_bounds = array<i64: 16, 9216>}, {transform_indices = @transform_1, window_bounds = array<i64: 32, 9216>}, {pipeline_mode = #tpu.pipeline_mode<synchronous>, transform_indices = @transform_2, window_bounds = array<i64: 32, 32>}, {pipeline_mode = #tpu.pipeline_mode<synchronous>, transform_indices = @transform_3, window_bounds = array<i64: 1, 32>}, {pipeline_mode = #tpu.pipeline_mode<synchronous>, transform_indices = @transform_4, window_bounds = array<i64: 1, 32>}, {pipeline_mode = #tpu.pipeline_mode<synchronous>, transform_indices = @transform_5, window_bounds = array<i64: 32, 128>}, {pipeline_mode = #tpu.pipeline_mode<synchronous>, transform_indices = @transform_6, window_bounds = array<i64: 16, 128>}]} {
    %c0 = arith.constant 0 : index
    %c0_0 = arith.constant 0 : index
    %0 = vector.load %arg1[%c0, %c0_0] : memref<16x9216xbf16, #tpu.memory_space<vmem>>, vector<16x9216xbf16>
    %c0_1 = arith.constant 0 : index
    %c0_2 = arith.constant 0 : index
    %1 = vector.load %arg2[%c0_1, %c0_2] : memref<32x9216xbf16, #tpu.memory_space<vmem>>, vector<32x9216xbf16>
    %cst = arith.constant dense<0.000000e+00> : vector<16x32xf32>
    %2 = tpu.matmul %0, %1, %cst {dimension_numbers = #tpu.dot_dimension_numbers<[1], [1], [0], [0], [0, 0, 1, 0], [], []>} : vector<16x9216xbf16>, vector<32x9216xbf16>, vector<16x32xf32> -> vector<16x32xf32>
    %cst_3 = arith.constant 0.000000e+00 : f32
    %3 = vector.broadcast %cst_3 : f32 to vector<16x32xf32>
    %4 = arith.maximumf %2, %3 : vector<16x32xf32>
    %5 = arith.truncf %4 : vector<16x32xf32> to vector<16x32xbf16>
    %c0_4 = arith.constant 0 : index
    %c0_5 = arith.constant 0 : index
    %6 = vector.load %arg3[%c0_4, %c0_5] : memref<32x32xbf16, #tpu.memory_space<vmem>>, vector<32x32xbf16>
    %cst_6 = arith.constant dense<0.000000e+00> : vector<16x32xf32>
    %7 = tpu.matmul %5, %6, %cst_6 {dimension_numbers = #tpu.dot_dimension_numbers<[1], [0], [0], [1], [0, 0, 1, 1], [], []>} : vector<16x32xbf16>, vector<32x32xbf16>, vector<16x32xf32> -> vector<16x32xf32>
    %cst_7 = arith.constant dense<0.000000e+00> : vector<32xf32>
    %8 = vector.multi_reduction <add>, %7, %cst_7 [0] : vector<16x32xf32> to vector<32xf32>
    %9 = vector.shape_cast %8 : vector<32xf32> to vector<1x32xf32>
    %cst_8 = arith.constant 1.600000e+01 : f32
    %10 = vector.broadcast %cst_8 : f32 to vector<1x32xf32>
    %11 = arith.divf %9, %10 : vector<1x32xf32>
    %12 = vector.broadcast %11 : vector<1x32xf32> to vector<16x32xf32>
    %13 = arith.subf %7, %12 : vector<16x32xf32>
    %14 = arith.mulf %13, %13 : vector<16x32xf32>
    %cst_9 = arith.constant dense<0.000000e+00> : vector<32xf32>
    %15 = vector.multi_reduction <add>, %14, %cst_9 [0] : vector<16x32xf32> to vector<32xf32>
    %16 = vector.shape_cast %15 : vector<32xf32> to vector<1x32xf32>
    %cst_10 = arith.constant 1.600000e+01 : f32
    %17 = vector.broadcast %cst_10 : f32 to vector<1x32xf32>
    %18 = arith.divf %16, %17 : vector<1x32xf32>
    %19 = vector.broadcast %11 : vector<1x32xf32> to vector<16x32xf32>
    %20 = arith.subf %7, %19 : vector<16x32xf32>
    %cst_11 = arith.constant 9.99999974E-6 : f32
    %21 = vector.broadcast %cst_11 : f32 to vector<1x32xf32>
    %22 = arith.addf %18, %21 : vector<1x32xf32>
    %23 = math.rsqrt %22 : vector<1x32xf32>
    %24 = vector.broadcast %23 : vector<1x32xf32> to vector<16x32xf32>
    %25 = arith.mulf %20, %24 : vector<16x32xf32>
    %c0_12 = arith.constant 0 : index
    %c0_13 = arith.constant 0 : index
    %26 = vector.load %arg4[%c0_12, %c0_13] : memref<1x32xf32, #tpu.memory_space<vmem>>, vector<1x32xf32>
    %27 = vector.broadcast %26 : vector<1x32xf32> to vector<16x32xf32>
    %28 = arith.mulf %25, %27 : vector<16x32xf32>
    %c0_14 = arith.constant 0 : index
    %c0_15 = arith.constant 0 : index
    %29 = vector.load %arg5[%c0_14, %c0_15] : memref<1x32xf32, #tpu.memory_space<vmem>>, vector<1x32xf32>
    %30 = vector.broadcast %29 : vector<1x32xf32> to vector<16x32xf32>
    %31 = arith.addf %28, %30 : vector<16x32xf32>
    %cst_16 = arith.constant 0.000000e+00 : f32
    %32 = vector.broadcast %cst_16 : f32 to vector<16x32xf32>
    %33 = arith.maximumf %31, %32 : vector<16x32xf32>
    %34 = arith.truncf %33 : vector<16x32xf32> to vector<16x32xbf16>
    %c0_17 = arith.constant 0 : index
    %c0_18 = arith.constant 0 : index
    %35 = vector.load %arg6[%c0_17, %c0_18] : memref<32x128xbf16, #tpu.memory_space<vmem>>, vector<32x128xbf16>
    %cst_19 = arith.constant dense<0.000000e+00> : vector<16x128xf32>
    %36 = tpu.matmul %34, %35, %cst_19 {dimension_numbers = #tpu.dot_dimension_numbers<[1], [0], [0], [1], [0, 0, 1, 1], [], []>} : vector<16x32xbf16>, vector<32x128xbf16>, vector<16x128xf32> -> vector<16x128xf32>
    %c0_20 = arith.constant 0 : index
    %c0_21 = arith.constant 0 : index
    %37 = vector.load %arg7[%c0_20, %c0_21] : memref<16x128xf32, #tpu.memory_space<vmem>>, vector<16x128xf32>
    tpu.vector_store %arg7[%c0_20, %c0_21], %36 {strides = array<i32>} : memref<16x128xf32, #tpu.memory_space<vmem>>, vector<16x128xf32>,
    return
  }
  func.func @transform_0(%arg0: i32) -> (i32, i32) {
    %c0_i32 = arith.constant 0 : i32
    %c0_i32_0 = arith.constant 0 : i32
    return %c0_i32, %arg0 : i32, i32
  }
  func.func @transform_1(%arg0: i32) -> (i32, i32) {
    %c0_i32 = arith.constant 0 : i32
    %c0_i32_0 = arith.constant 0 : i32
    return %c0_i32, %arg0 : i32, i32
  }
  func.func @transform_2(%arg0: i32) -> (i32, i32) {
    %c0_i32 = arith.constant 0 : i32
    %c0_i32_0 = arith.constant 0 : i32
    %c0_i32_1 = arith.constant 0 : i32
    return %c0_i32, %c0_i32_0 : i32, i32
  }
  func.func @transform_3(%arg0: i32) -> (i32, i32) {
    %c0_i32 = arith.constant 0 : i32
    %c0_i32_0 = arith.constant 0 : i32
    %c0_i32_1 = arith.constant 0 : i32
    return %c0_i32, %c0_i32_0 : i32, i32
  }
  func.func @transform_4(%arg0: i32) -> (i32, i32) {
    %c0_i32 = arith.constant 0 : i32
    %c0_i32_0 = arith.constant 0 : i32
    %c0_i32_1 = arith.constant 0 : i32
    return %c0_i32, %c0_i32_0 : i32, i32
  }
  func.func @transform_5(%arg0: i32) -> (i32, i32) {
    %c0_i32 = arith.constant 0 : i32
    %c0_i32_0 = arith.constant 0 : i32
    %c0_i32_1 = arith.constant 0 : i32
    return %c0_i32, %c0_i32_0 : i32, i32
  }
  func.func @transform_6(%arg0: i32) -> (i32, i32) {
    %c0_i32 = arith.constant 0 : i32
    %c0_i32_0 = arith.constant 0 : i32
    %c0_i32_1 = arith.constant 0 : i32
    return %c0_i32, %c0_i32_0 : i32, i32
  }
}

</mosaic_0001>

<bundles_post_ra>
// kernel: tpu_custom_call.1
= control target key start
LH: loop header
LB: loop body
LE: loop exit
PB: predicated region body
PF: predicated region fallthrough
CT: control target
= control target key end

     0   :  { %11 = vsyncpa [#allocation3], 0  ;;  %s3650_s0 = inlined_call_operand.hbm [shape: bf16[16,9216], index: 0, kind: input, shape index: {}]   ;;  %s3651_s1 = inlined_call_operand.hbm [shape: bf16[32,9216], index: 1, kind: input, shape index: {}]   ;;  %s3652_s2 = inlined_call_operand.hbm [shape: bf16[32,32], index: 2, kind: input, shape index: {}]   ;;  %s3653_s3 = inlined_call_operand.vmem [shape: f32[1,32], index: 3, kind: input, shape index: {}]   ;;  %s3654_s4 = inlined_call_operand.vmem [shape: f32[1,32], index: 4, kind: input, shape index: {}]   ;;  %s3655_s5 = inlined_call_operand.vmem [shape: bf16[32,128], index: 5, kind: input, shape index: {}]   ;;  %s3656_s6 = inlined_call_operand.hbm [shape: f32[16,128], index: 6, kind: output, shape index: {}]  }
   0x1   :  { %12 = vsyncpa [#allocation6], 0 }
   0x2   :  { %13 = vsyncpa [#allocation4], 0  ;;  %s3528_s21 = smov [#allocation5]   ;;  %s3529_s23 = smov [#allocation2]  }
   0x3   :  { %s31_s22 = sshll.u32 %s3528_s21, 4  ;;  %s19_s24 = sshll.u32 %s3529_s23, 4  ;;  %s32_s22 = int_to_ptr.vmem [resolvable:$true] %s31_s22  ;;  %s3575_s24 = int_to_ptr.vmem [resolvable:$true] %s19_s24 }
   0x4   :  { %s3434_s27 = scalar_lea.hbm %s3651_s1, 18432 }
   0x5   :  { %p3435_p0 = scmp.ne.s32.totalorder %s3651_s1, %s3434_s27  ;;  %p3438_p1 = scmp.lt.u32.totalorder %s3434_s27, %s3651_s1 }
   0x7   :  { %p3440_p2 = pnand %p3438_p1, %p3435_p0 }
   0x9   :  { %3443 = shalt.err (!%p3440_p2)
}
   0xa   :  { %s3444_s8 = scalar_lea.vmem %s32_s22, 18432  ;;  %p3449_p4 = scmp.lt.s32.totalorder %s32_s22, %s32_s22 }
   0xb   :  { %p3445_p3 = scmp.ne.s32.totalorder %s32_s22, %s3444_s8  ;;  %p3450_p5 = scmp.lt.s32.totalorder %s3444_s8, %s3444_s8 }
   0xd   :  { %p3451_p6 = por %p3450_p5, %p3449_p4 }
   0xf   :  { %p3452_p7 = pnand %p3451_p6, %p3445_p3 }
  0x11   :  { %3455 = shalt.err (!%p3452_p7)
}
  0x12   :  { %s3530_s9 = smov 4608   ;;  %s3531_s10 = smov 288  }
  0x13   :  { %37 = dma.hbm_to_vmem [thread:$0]  %s3651_s1, 18432, %s32_s22, [#allocation6], %s3530_s9, %s3530_s9, %s3531_s10  }
  0x14   :  { %s3456_s15 = scalar_lea.hbm %s3650_s0, 9216 }
  0x15   :  { %p3457_p8 = scmp.ne.s32.totalorder %s3650_s0, %s3456_s15  ;;  %p3460_p9 = scmp.lt.u32.totalorder %s3456_s15, %s3650_s0 }
  0x17   :  { %p3462_p10 = pnand %p3460_p9, %p3457_p8 }
  0x19   :  { %3465 = shalt.err (!%p3462_p10)
}
  0x1a   :  { %s3466_s20 = scalar_lea.vmem %s3575_s24, 9216  ;;  %p3471_p12 = scmp.lt.s32.totalorder %s3575_s24, %s3575_s24 }
  0x1b   :  { %p3467_p11 = scmp.ne.s32.totalorder %s3575_s24, %s3466_s20  ;;  %p3472_p13 = scmp.lt.s32.totalorder %s3466_s20, %s3466_s20 }
  0x1d   :  { %p3473_p0 = por %p3472_p13, %p3471_p12 }
  0x1f   :  { %p3474_p1 = pnand %p3473_p0, %p3467_p11 }
  0x21   :  { %3477 = shalt.err (!%p3474_p1)
}
  0x22   :  { %25 = dma.hbm_to_vmem [thread:$0]  %s3650_s0, 9216, %s3575_s24, [#allocation3], %s3530_s9, %s3530_s9, %s3531_s10  }
  0x23   :  { %s3532_s22 = smov [#allocation7]   ;;  %s3478_s27 = scalar_lea.hbm %s3652_s2, 256 }
  0x24   :  { %s43_s23 = sshll.u32 %s3532_s22, 4  ;;  %p3479_p2 = scmp.ne.s32.totalorder %s3652_s2, %s3478_s27  ;;  %s44_s23 = int_to_ptr.vmem [resolvable:$true] %s43_s23 }
  0x25   :  { %p3482_p3 = scmp.lt.u32.totalorder %s3478_s27, %s3652_s2 }
  0x27   :  { %p3484_p4 = pnand %p3482_p3, %p3479_p2 }
  0x29   :  { %3487 = shalt.err (!%p3484_p4)
}
  0x2a   :  { %s3488_s8 = scalar_lea.vmem %s44_s23, 256  ;;  %p3493_p6 = scmp.lt.s32.totalorder %s44_s23, %s44_s23 }
  0x2b   :  { %p3489_p5 = scmp.ne.s32.totalorder %s44_s23, %s3488_s8  ;;  %p3494_p7 = scmp.lt.s32.totalorder %s3488_s8, %s3488_s8 }
  0x2d   :  { %p3495_p8 = por %p3494_p7, %p3493_p6 }
  0x2f   :  { %p3496_p9 = pnand %p3495_p8, %p3489_p5 }
  0x31   :  { %3499 = shalt.err (!%p3496_p9)
}
  0x32   :  { %s3533_s0 = smov 64   ;;  %s3534_s24 = smov 4  }
  0x33   :  { %49 = dma.hbm_to_vmem [thread:$0]  %s3652_s2, 256, %s44_s23, [#allocation6], %s3533_s0, %s3533_s0, %s3534_s24  }
  0x34   :  { %3522 = dma.done.wait [#allocation3], 9216  }
  0x35   :  { %3523 = vsyncadd [#allocation3], 4294958080 }
  0x36   :  { %3524 = dma.done.wait [#allocation6], 18688  }
  0x37   :  { %3525 = vsyncadd [#allocation6], 4294948608  ;;  %v138_v0 = vld [vmem:[#allocation5] sm:$0xff]  ;;  %v155_v2 = vld [vmem:[#allocation5 + $0x88] sm:$0xff]  ;;  %vm3536_vm0 = vmmov 0   ;;  %vm2857_vm1 = vcmask 261120  }
  0x38   :  { %v174_v1 = vld [vmem:[#allocation5 + $0x120] sm:$0xff]  ;;  %v191_v4 = vld [vmem:[#allocation5 + $0x1a8] sm:$0xff]  ;;  %v156_v22 = vld [vmem:[#allocation5 + $0x90] sm:$0xff]  ;;  %s3537_s17 = smov [#allocation8]  }
  0x39   :  { %v3105_v3 = vcombine.high %v138_v0, %v174_v1  ;;  %v3104_v5 = vcombine.low %v138_v0, %v174_v1  ;;  %v210_v6 = vld [vmem:[#allocation5 + $0x240] sm:$0xff]  ;;  %v3139_v8 = vcombine.high %v155_v2, %v191_v4  ;;  %v3138_v9 = vcombine.low %v155_v2, %v191_v4  ;;  %v227_v11 = vld [vmem:[#allocation5 + $0x2c8] sm:$0xff]  ;;  %v192_v23 = vld [vmem:[#allocation5 + $0x1b0] sm:$0xff]  ;;  %s3019_s18 = sshll.u32 %s3537_s17, 4  ;;  %s3020_s18 = int_to_ptr.vmem [resolvable:$true] %s3019_s18 }
  0x3a   :  { %v246_v7 = vld [vmem:[#allocation5 + $0x360] sm:$0xff]  ;;  %v263_v12 = vld [vmem:[#allocation5 + $0x3e8] sm:$0xff]  ;;  %v3141_v27 = vcombine.high %v156_v22, %v192_v23  ;;  %v228_v30 = vld [vmem:[#allocation5 + $0x2d0] sm:$0xff]  ;;  %v3140_v39 = vcombine.low %v156_v22, %v192_v23  ;;  %p3505_p11 = scmp.lt.s32.totalorder %s3020_s18, %s3020_s18 }
  0x3b   :  { %v3177_v10 = vcombine.high %v210_v6, %v246_v7  ;;  %v66_v13 = vld [vmem:[#allocation2] sm:$0xff]  ;;  %1362 = vmatprep.subr.bf16.mxu1 %v3105_v3  ;;  %v3211_v14 = vcombine.high %v227_v11, %v263_v12  ;;  %2059 = vmatprep.subr.bf16.mxu0 %v3139_v8  ;;  %v83_v17 = vld [vmem:[#allocation2 + $0x88] sm:$0xff]  ;;  %v3176_v24 = vcombine.low %v210_v6, %v246_v7  ;;  %v264_v32 = vld [vmem:[#allocation5 + $0x3f0] sm:$0xff] }
  0x3c   :  { %v102_v15 = vld [vmem:[#allocation2 + $0x120] sm:$0xff]  ;;  %1363 = vmatpush1.bf16.xpose.msra.mxu1 %v3104_v5  ;;  %v119_v18 = vld [vmem:[#allocation2 + $0x1a8] sm:$0xff]  ;;  %2060 = vmatpush1.bf16.xpose.msra.mxu0 %v3138_v9  ;;  %v3210_v25 = vcombine.low %v227_v11, %v263_v12  ;;  %v84_v37 = vld [vmem:[#allocation2 + $0x90] sm:$0xff]  ;;  %v3213_v41 = vcombine.high %v228_v30, %v264_v32  ;;  %v3212_v49 = vcombine.low %v228_v30, %v264_v32 }
  0x3d   :  { %v3033_v16 = vcombine.high %v66_v13, %v102_v15  ;;  %1364 = vmatprep.subr.bf16.mxu1 %v3177_v10  ;;  %v3067_v19 = vcombine.high %v83_v17, %v119_v18  ;;  %2061 = vmatprep.subr.bf16.mxu0 %v3211_v14  ;;  %v139_v20 = vld [vmem:[#allocation5 + $0x8] sm:$0xff]  ;;  %v3032_v31 = vcombine.low %v66_v13, %v102_v15  ;;  %v120_v38 = vld [vmem:[#allocation2 + $0x1b0] sm:$0xff]  ;;  %v157_v46 = vld [vmem:[#allocation5 + $0x98] sm:$0xff] }
  0x3e   :  { %v175_v21 = vld [vmem:[#allocation5 + $0x128] sm:$0xff]  ;;  %v3066_v36 = vcombine.low %v83_v17, %v119_v18  ;;  %v3069_v43 = vcombine.high %v84_v37, %v120_v38  ;;  %v140_v44 = vld [vmem:[#allocation5 + $0x10] sm:$0xff]  ;;  %v193_v47 = vld [vmem:[#allocation5 + $0x1b8] sm:$0xff]  ;;  %v3068_v60 = vcombine.low %v84_v37, %v120_v38 }
  0x3f   :  { %1394 = vmatprep.mubr.bf16.mxu1 %v3033_v16  ;;  %2091 = vmatprep.mubr.bf16.mxu0 %v3067_v19  ;;  %v3107_v26 = vcombine.high %v139_v20, %v175_v21  ;;  %v211_v28 = vld [vmem:[#allocation5 + $0x248] sm:$0xff]  ;;  %v3106_v35 = vcombine.low %v139_v20, %v175_v21  ;;  %v176_v45 = vld [vmem:[#allocation5 + $0x130] sm:$0xff]  ;;  %v3143_v51 = vcombine.high %v157_v46, %v193_v47  ;;  %v229_v54 = vld [vmem:[#allocation5 + $0x2d8] sm:$0xff] }
  0x40   :  { %v247_v29 = vld [vmem:[#allocation5 + $0x368] sm:$0xff]  ;;  %v3109_v50 = vcombine.high %v140_v44, %v176_v45  ;;  %v212_v52 = vld [vmem:[#allocation5 + $0x250] sm:$0xff]  ;;  %v265_v56 = vld [vmem:[#allocation5 + $0x3f8] sm:$0xff]  ;;  %v3108_v59 = vcombine.low %v140_v44, %v176_v45  ;;  %v3142_v63 = vcombine.low %v157_v46, %v193_v47 }
  0x41   :  { %v67_v33 = vld [vmem:[#allocation2 + $0x8] sm:$0xff]  ;;  %v3179_v40 = vcombine.high %v211_v28, %v247_v29  ;;  %v3178_v48 = vcombine.low %v211_v28, %v247_v29  ;;  %v248_v53 = vld [vmem:[#allocation5 + $0x370] sm:$0xff]  ;;  %v85_v61 = vld [vmem:[#allocation2 + $0x98] sm:$0xff]  ;;  %v3215_v1 = vcombine.high %v229_v54, %v265_v56  ;;  %v3214_v9 = vcombine.low %v229_v54, %v265_v56 }
  0x42   :  { %v103_v34 = vld [vmem:[#allocation2 + $0x128] sm:$0xff]  ;;  %v68_v57 = vld [vmem:[#allocation2 + $0x10] sm:$0xff]  ;;  %v121_v62 = vld [vmem:[#allocation2 + $0x1b8] sm:$0xff]  ;;  %v3181_v0 = vcombine.high %v212_v52, %v248_v53  ;;  %v3180_v8 = vcombine.low %v212_v52, %v248_v53 }
  0x43   :  { %v3035_v42 = vcombine.high %v67_v33, %v103_v34  ;;  %v3034_v55 = vcombine.low %v67_v33, %v103_v34  ;;  %v104_v58 = vld [vmem:[#allocation2 + $0x130] sm:$0xff]  ;;  %v3071_v3 = vcombine.high %v85_v61, %v121_v62  ;;  %v141_v4 = vld [vmem:[#allocation5 + $0x18] sm:$0xff]  ;;  %v158_v6 = vld [vmem:[#allocation5 + $0xa0] sm:$0xff]  ;;  %v3070_v20 = vcombine.low %v85_v61, %v121_v62 }
  0x44   :  { %1365 = vmatpush1.bf16.xpose.msra.mxu1 %v3176_v24  ;;  %2062 = vmatpush1.bf16.xpose.msra.mxu0 %v3210_v25  ;;  %v3037_v2 = vcombine.high %v68_v57, %v104_v58  ;;  %v177_v5 = vld [vmem:[#allocation5 + $0x138] sm:$0xff]  ;;  %v194_v7 = vld [vmem:[#allocation5 + $0x1c0] sm:$0xff]  ;;  %v3036_v16 = vcombine.low %v68_v57, %v104_v58  ;;  %v159_v30 = vld [vmem:[#allocation5 + $0xa8] sm:$0xff] }
  0x45   :  { %1403 = vmatprep.subr.bf16.mxu1 %v3107_v26  ;;  %2100 = vmatprep.subr.bf16.mxu0 %v3141_v27  ;;  %v3111_v10 = vcombine.high %v141_v4, %v177_v5  ;;  %v3145_v11 = vcombine.high %v158_v6, %v194_v7  ;;  %v213_v12 = vld [vmem:[#allocation5 + $0x258] sm:$0xff]  ;;  %v230_v14 = vld [vmem:[#allocation5 + $0x2e0] sm:$0xff]  ;;  %v3110_v19 = vcombine.low %v141_v4, %v177_v5  ;;  %v231_v38 = vld [vmem:[#allocation5 + $0x2e8] sm:$0xff] }
  0x46   :  { %v249_v13 = vld [vmem:[#allocation5 + $0x378] sm:$0xff]  ;;  %v266_v15 = vld [vmem:[#allocation5 + $0x400] sm:$0xff]  ;;  %v3144_v23 = vcombine.low %v158_v6, %v194_v7  ;;  %v87_v45 = vld [vmem:[#allocation2 + $0xa8] sm:$0xff] }
  0x47   :  { %v69_v17 = vld [vmem:[#allocation2 + $0x18] sm:$0xff]  ;;  %v86_v21 = vld [vmem:[#allocation2 + $0xa0] sm:$0xff]  ;;  %v3183_v24 = vcombine.high %v213_v12, %v249_v13  ;;  %v3217_v25 = vcombine.high %v230_v14, %v266_v15  ;;  %v3182_v32 = vcombine.low %v213_v12, %v249_v13  ;;  %v3216_v33 = vcombine.low %v230_v14, %v266_v15  ;;  %v123_v46 = vld [vmem:[#allocation2 + $0x1c8] sm:$0xff] }
  0x48   :  { %v105_v18 = vld [vmem:[#allocation2 + $0x138] sm:$0xff]  ;;  %v122_v22 = vld [vmem:[#allocation2 + $0x1c0] sm:$0xff]  ;;  %v143_v52 = vld [vmem:[#allocation5 + $0x28] sm:$0xff]  ;;  %v3074_v4 = vcombine.low %v87_v45, %v123_v46 }
  0x49   :  { %v3039_v26 = vcombine.high %v69_v17, %v105_v18  ;;  %v3073_v27 = vcombine.high %v86_v21, %v122_v22  ;;  %v142_v28 = vld [vmem:[#allocation5 + $0x20] sm:$0xff]  ;;  %v3072_v44 = vcombine.low %v86_v21, %v122_v22  ;;  %v179_v53 = vld [vmem:[#allocation5 + $0x148] sm:$0xff]  ;;  %v160_v54 = vld [vmem:[#allocation5 + $0xb0] sm:$0xff] }
  0x4a   :  { %v178_v29 = vld [vmem:[#allocation5 + $0x140] sm:$0xff]  ;;  %v3115_v58 = vcombine.high %v143_v52, %v179_v53  ;;  %v251_v61 = vld [vmem:[#allocation5 + $0x388] sm:$0xff]  ;;  %v232_v62 = vld [vmem:[#allocation5 + $0x2f0] sm:$0xff] }
  0x4b   :  { %1395 = vmatmul.mubr.bf16.vlgmr.msra.gmra.mrb[0].mxu1 %v3032_v31  ;;  %2092 = vmatmul.mubr.bf16.vlgmr.msra.gmra.mrb[0].mxu0 %v3066_v36  ;;  %v195_v31 = vld [vmem:[#allocation5 + $0x1c8] sm:$0xff]  ;;  %v3113_v34 = vcombine.high %v142_v28, %v178_v29  ;;  %v214_v36 = vld [vmem:[#allocation5 + $0x260] sm:$0xff]  ;;  %v88_v5 = vld [vmem:[#allocation2 + $0xb0] sm:$0xff] }
  0x4c   :  { %1404 = vmatpush1.bf16.xpose.msra.mxu1 %v3106_v35  ;;  %2101 = vmatpush1.bf16.xpose.msra.mxu0 %v3140_v39  ;;  %v3147_v35 = vcombine.high %v159_v30, %v195_v31  ;;  %v250_v37 = vld [vmem:[#allocation5 + $0x380] sm:$0xff]  ;;  %v3038_v39 = vcombine.low %v69_v17, %v105_v18  ;;  %v3146_v47 = vcombine.low %v159_v30, %v195_v31  ;;  %v124_v6 = vld [vmem:[#allocation2 + $0x1d0] sm:$0xff]  ;;  %v161_v14 = vld [vmem:[#allocation5 + $0xb8] sm:$0xff] }
  0x4d   :  { %1405 = vmatprep.subr.bf16.mxu1 %v3179_v40  ;;  %2102 = vmatprep.subr.bf16.mxu0 %v3213_v41  ;;  %v267_v40 = vld [vmem:[#allocation5 + $0x408] sm:$0xff]  ;;  %v70_v41 = vld [vmem:[#allocation2 + $0x20] sm:$0xff]  ;;  %v3184_v56 = vcombine.low %v214_v36, %v250_v37  ;;  %v144_v12 = vld [vmem:[#allocation5 + $0x30] sm:$0xff] }
  0x4e   :  { %1435 = vmatprep.mubr.bf16.mxu1 %v3035_v42  ;;  %2132 = vmatprep.mubr.bf16.mxu0 %v3069_v43  ;;  %v106_v42 = vld [vmem:[#allocation2 + $0x140] sm:$0xff]  ;;  %v3112_v43 = vcombine.low %v142_v28, %v178_v29  ;;  %v3218_v57 = vcombine.low %v231_v38, %v267_v40  ;;  %v180_v13 = vld [vmem:[#allocation5 + $0x150] sm:$0xff]  ;;  %v197_v15 = vld [vmem:[#allocation5 + $0x1d8] sm:$0xff]  ;;  %v3076_v28 = vcombine.low %v88_v5, %v124_v6 }
  0x4f   :  { %v3117_v18 = vcombine.high %v144_v12, %v180_v13  ;;  %v252_v21 = vld [vmem:[#allocation5 + $0x390] sm:$0xff]  ;;  %v233_v22 = vld [vmem:[#allocation5 + $0x2f8] sm:$0xff]  ;;  %v3150_v31 = vcombine.low %v161_v14, %v197_v15 }
  0x50   :  { %v89_v29 = vld [vmem:[#allocation2 + $0xb8] sm:$0xff] }
  0x51   :  { %v125_v30 = vld [vmem:[#allocation2 + $0x1d8] sm:$0xff] }
  0x54   :  { %1406 = vmatpush1.bf16.xpose.msra.mxu1 %v3178_v48  ;;  %2103 = vmatpush1.bf16.xpose.msra.mxu0 %v3212_v49  ;;  %v3185_v48 = vcombine.high %v214_v36, %v250_v37  ;;  %v3219_v49 = vcombine.high %v231_v38, %v267_v40  ;;  %v145_v36 = vld [vmem:[#allocation5 + $0x38] sm:$0xff]  ;;  %v162_v38 = vld [vmem:[#allocation5 + $0xc0] sm:$0xff] }
  0x55   :  { %1444 = vmatprep.subr.bf16.mxu1 %v3109_v50  ;;  %2141 = vmatprep.subr.bf16.mxu0 %v3143_v51  ;;  %v3041_v50 = vcombine.high %v70_v41, %v106_v42  ;;  %v3075_v51 = vcombine.high %v87_v45, %v123_v46  ;;  %v181_v37 = vld [vmem:[#allocation5 + $0x158] sm:$0xff]  ;;  %v234_v46 = vld [vmem:[#allocation5 + $0x300] sm:$0xff] }
  0x56   :  { %v253_v45 = vld [vmem:[#allocation5 + $0x398] sm:$0xff] }
  0x5b   :  { %1436 = vmatmul.mubr.bf16.vlgmr.msra.gmra.mrb[0].mxu1 %v3034_v55  ;;  %2133 = vmatmul.mubr.bf16.vlgmr.msra.gmra.mrb[0].mxu0 %v3068_v60  ;;  %v196_v55 = vld [vmem:[#allocation5 + $0x1d0] sm:$0xff]  ;;  %v215_v60 = vld [vmem:[#allocation5 + $0x268] sm:$0xff] }
  0x5c   :  { %1445 = vmatpush1.bf16.xpose.msra.mxu1 %v3108_v59  ;;  %2142 = vmatpush1.bf16.xpose.msra.mxu0 %v3142_v63  ;;  %v3149_v59 = vcombine.high %v160_v54, %v196_v55  ;;  %v3040_v63 = vcombine.low %v70_v41, %v106_v42  ;;  %v3148_v7 = vcombine.low %v160_v54, %v196_v55  ;;  %v126_v54 = vld [vmem:[#allocation2 + $0x1e0] sm:$0xff] }
  0x5d   :  { %1446 = vmatprep.subr.bf16.mxu1 %v3181_v0  ;;  %2143 = vmatprep.subr.bf16.mxu0 %v3215_v1  ;;  %v268_v0 = vld [vmem:[#allocation5 + $0x410] sm:$0xff]  ;;  %v71_v1 = vld [vmem:[#allocation2 + $0x28] sm:$0xff]  ;;  %v3119_v42 = vcombine.high %v145_v36, %v181_v37 }
  0x5e   :  { %1476 = vmatprep.mubr.bf16.mxu1 %v3037_v2  ;;  %2173 = vmatprep.mubr.bf16.mxu0 %v3071_v3  ;;  %v107_v2 = vld [vmem:[#allocation2 + $0x148] sm:$0xff]  ;;  %v3114_v3 = vcombine.low %v143_v52, %v179_v53  ;;  %v3220_v17 = vcombine.low %v232_v62, %v268_v0  ;;  %v3078_v52 = vcombine.low %v89_v29, %v125_v30  ;;  %v90_v53 = vld [vmem:[#allocation2 + $0xc0] sm:$0xff] }
  0x64   :  { %1447 = vmatpush1.bf16.xpose.msra.mxu1 %v3180_v8  ;;  %2144 = vmatpush1.bf16.xpose.msra.mxu0 %v3214_v9  ;;  %v3187_v8 = vcombine.high %v215_v60, %v251_v61  ;;  %v3221_v9 = vcombine.high %v232_v62, %v268_v0  ;;  %v163_v62 = vld [vmem:[#allocation5 + $0xc8] sm:$0xff] }
  0x65   :  { %1485 = vmatprep.subr.bf16.mxu1 %v3111_v10  ;;  %2182 = vmatprep.subr.bf16.mxu0 %v3145_v11  ;;  %v3043_v10 = vcombine.high %v71_v1, %v107_v2  ;;  %v3077_v11 = vcombine.high %v88_v5, %v124_v6  ;;  %v254_v5 = vld [vmem:[#allocation5 + $0x3a0] sm:$0xff]  ;;  %v235_v6 = vld [vmem:[#allocation5 + $0x308] sm:$0xff] }
  0x6b   :  { %1477 = vmatmul.mubr.bf16.vlgmr.msra.gmra.mrb[0].mxu1 %v3036_v16  ;;  %2174 = vmatmul.mubr.bf16.vlgmr.msra.gmra.mrb[0].mxu0 %v3070_v20  ;;  %v3186_v16 = vcombine.low %v215_v60, %v251_v61  ;;  %v216_v20 = vld [vmem:[#allocation5 + $0x270] sm:$0xff]  ;;  %v146_v60 = vld [vmem:[#allocation5 + $0x40] sm:$0xff] }
  0x6c   :  { %1486 = vmatpush1.bf16.xpose.msra.mxu1 %v3110_v19  ;;  %2183 = vmatpush1.bf16.xpose.msra.mxu0 %v3144_v23  ;;  %v3151_v19 = vcombine.high %v161_v14, %v197_v15  ;;  %v3042_v23 = vcombine.low %v71_v1, %v107_v2  ;;  %v3188_v40 = vcombine.low %v216_v20, %v252_v21  ;;  %v182_v61 = vld [vmem:[#allocation5 + $0x160] sm:$0xff]  ;;  %v127_v14 = vld [vmem:[#allocation2 + $0x1e8] sm:$0xff] }
  0x6d   :  { %1487 = vmatprep.subr.bf16.mxu1 %v3183_v24  ;;  %2184 = vmatprep.subr.bf16.mxu0 %v3217_v25  ;;  %v269_v24 = vld [vmem:[#allocation5 + $0x418] sm:$0xff]  ;;  %v72_v25 = vld [vmem:[#allocation2 + $0x30] sm:$0xff]  ;;  %v3121_v2 = vcombine.high %v146_v60, %v182_v61 }
  0x6e   :  { %1517 = vmatprep.mubr.bf16.mxu1 %v3039_v26  ;;  %2214 = vmatprep.mubr.bf16.mxu0 %v3073_v27  ;;  %v108_v26 = vld [vmem:[#allocation2 + $0x150] sm:$0xff]  ;;  %v3116_v27 = vcombine.low %v144_v12, %v180_v13  ;;  %v3222_v41 = vcombine.low %v233_v22, %v269_v24  ;;  %v3080_v12 = vcombine.low %v90_v53, %v126_v54  ;;  %v91_v13 = vld [vmem:[#allocation2 + $0xc8] sm:$0xff] }
  0x74   :  { %1488 = vmatpush1.bf16.xpose.msra.mxu1 %v3182_v32  ;;  %2185 = vmatpush1.bf16.xpose.msra.mxu0 %v3216_v33  ;;  %v3189_v32 = vcombine.high %v216_v20, %v252_v21  ;;  %v3223_v33 = vcombine.high %v233_v22, %v269_v24  ;;  %v147_v20 = vld [vmem:[#allocation5 + $0x48] sm:$0xff]  ;;  %v164_v22 = vld [vmem:[#allocation5 + $0xd0] sm:$0xff] }
  0x75   :  { %1526 = vmatprep.subr.bf16.mxu1 %v3113_v34  ;;  %2223 = vmatprep.subr.bf16.mxu0 %v3147_v35  ;;  %v3045_v34 = vcombine.high %v72_v25, %v108_v26  ;;  %v3079_v35 = vcombine.high %v89_v29, %v125_v30  ;;  %v183_v21 = vld [vmem:[#allocation5 + $0x168] sm:$0xff]  ;;  %v236_v30 = vld [vmem:[#allocation5 + $0x310] sm:$0xff] }
  0x76   :  { %v255_v29 = vld [vmem:[#allocation5 + $0x3a8] sm:$0xff] }
  0x7b   :  { %1518 = vmatmul.mubr.bf16.vlgmr.msra.gmra.mrb[0].mxu1 %v3038_v39  ;;  %2215 = vmatmul.mubr.bf16.vlgmr.msra.gmra.mrb[0].mxu0 %v3072_v44  ;;  %v198_v39 = vld [vmem:[#allocation5 + $0x1e0] sm:$0xff]  ;;  %v217_v44 = vld [vmem:[#allocation5 + $0x278] sm:$0xff] }
  0x7c   :  { %1527 = vmatpush1.bf16.xpose.msra.mxu1 %v3112_v43  ;;  %2224 = vmatpush1.bf16.xpose.msra.mxu0 %v3146_v47  ;;  %v3153_v43 = vcombine.high %v162_v38, %v198_v39  ;;  %v3044_v47 = vcombine.low %v72_v25, %v108_v26  ;;  %v3152_v55 = vcombine.low %v162_v38, %v198_v39  ;;  %v128_v38 = vld [vmem:[#allocation2 + $0x1f0] sm:$0xff] }
  0x7d   :  { %1528 = vmatprep.subr.bf16.mxu1 %v3185_v48  ;;  %2225 = vmatprep.subr.bf16.mxu0 %v3219_v49  ;;  %v270_v48 = vld [vmem:[#allocation5 + $0x420] sm:$0xff]  ;;  %v73_v49 = vld [vmem:[#allocation2 + $0x38] sm:$0xff]  ;;  %v3190_v0 = vcombine.low %v217_v44, %v253_v45  ;;  %v3123_v26 = vcombine.high %v147_v20, %v183_v21 }
  0x7e   :  { %1558 = vmatprep.mubr.bf16.mxu1 %v3041_v50  ;;  %2255 = vmatprep.mubr.bf16.mxu0 %v3075_v51  ;;  %v109_v50 = vld [vmem:[#allocation2 + $0x158] sm:$0xff]  ;;  %v3118_v51 = vcombine.low %v145_v36, %v181_v37  ;;  %v3224_v1 = vcombine.low %v234_v46, %v270_v48  ;;  %v3082_v36 = vcombine.low %v91_v13, %v127_v14  ;;  %v92_v37 = vld [vmem:[#allocation2 + $0xd0] sm:$0xff] }
  0x84   :  { %1529 = vmatpush1.bf16.xpose.msra.mxu1 %v3184_v56  ;;  %2226 = vmatpush1.bf16.xpose.msra.mxu0 %v3218_v57  ;;  %v3191_v56 = vcombine.high %v217_v44, %v253_v45  ;;  %v3225_v57 = vcombine.high %v234_v46, %v270_v48  ;;  %v148_v44 = vld [vmem:[#allocation5 + $0x50] sm:$0xff]  ;;  %v165_v46 = vld [vmem:[#allocation5 + $0xd8] sm:$0xff] }
  0x85   :  { %1567 = vmatprep.subr.bf16.mxu1 %v3115_v58  ;;  %2264 = vmatprep.subr.bf16.mxu0 %v3149_v59  ;;  %v3047_v58 = vcombine.high %v73_v49, %v109_v50  ;;  %v3081_v59 = vcombine.high %v90_v53, %v126_v54  ;;  %v184_v45 = vld [vmem:[#allocation5 + $0x170] sm:$0xff]  ;;  %v237_v54 = vld [vmem:[#allocation5 + $0x318] sm:$0xff] }
  0x86   :  { %v256_v53 = vld [vmem:[#allocation5 + $0x3b0] sm:$0xff] }
  0x8b   :  { %1559 = vmatmul.mubr.bf16.vlgmr.msra.gmra.mrb[0].mxu1 %v3040_v63  ;;  %2256 = vmatmul.mubr.bf16.vlgmr.msra.gmra.mrb[0].mxu0 %v3074_v4  ;;  %v199_v63 = vld [vmem:[#allocation5 + $0x1e8] sm:$0xff]  ;;  %v218_v4 = vld [vmem:[#allocation5 + $0x280] sm:$0xff] }
  0x8c   :  { %1568 = vmatpush1.bf16.xpose.msra.mxu1 %v3114_v3  ;;  %2265 = vmatpush1.bf16.xpose.msra.mxu0 %v3148_v7  ;;  %v3155_v3 = vcombine.high %v163_v62, %v199_v63  ;;  %v3046_v7 = vcombine.low %v73_v49, %v109_v50  ;;  %v3154_v15 = vcombine.low %v163_v62, %v199_v63  ;;  %v129_v62 = vld [vmem:[#allocation2 + $0x1f8] sm:$0xff] }
  0x8d   :  { %1569 = vmatprep.subr.bf16.mxu1 %v3187_v8  ;;  %2266 = vmatprep.subr.bf16.mxu0 %v3221_v9  ;;  %v271_v8 = vld [vmem:[#allocation5 + $0x428] sm:$0xff]  ;;  %v74_v9 = vld [vmem:[#allocation2 + $0x40] sm:$0xff]  ;;  %v3192_v24 = vcombine.low %v218_v4, %v254_v5  ;;  %v3125_v50 = vcombine.high %v148_v44, %v184_v45 }
  0x8e   :  { %1599 = vmatprep.mubr.bf16.mxu1 %v3043_v10  ;;  %2296 = vmatprep.mubr.bf16.mxu0 %v3077_v11  ;;  %v110_v10 = vld [vmem:[#allocation2 + $0x160] sm:$0xff]  ;;  %v3120_v11 = vcombine.low %v146_v60, %v182_v61  ;;  %v3226_v25 = vcombine.low %v235_v6, %v271_v8  ;;  %v3084_v60 = vcombine.low %v92_v37, %v128_v38  ;;  %v93_v61 = vld [vmem:[#allocation2 + $0xd8] sm:$0xff] }
  0x94   :  { %1570 = vmatpush1.bf16.xpose.msra.mxu1 %v3186_v16  ;;  %2267 = vmatpush1.bf16.xpose.msra.mxu0 %v3220_v17  ;;  %v3193_v16 = vcombine.high %v218_v4, %v254_v5  ;;  %v3227_v17 = vcombine.high %v235_v6, %v271_v8  ;;  %v149_v4 = vld [vmem:[#allocation5 + $0x58] sm:$0xff]  ;;  %v166_v6 = vld [vmem:[#allocation5 + $0xe0] sm:$0xff] }
  0x95   :  { %1608 = vmatprep.subr.bf16.mxu1 %v3117_v18  ;;  %2305 = vmatprep.subr.bf16.mxu0 %v3151_v19  ;;  %v3049_v18 = vcombine.high %v74_v9, %v110_v10  ;;  %v3083_v19 = vcombine.high %v91_v13, %v127_v14  ;;  %v185_v5 = vld [vmem:[#allocation5 + $0x178] sm:$0xff]  ;;  %v238_v14 = vld [vmem:[#allocation5 + $0x320] sm:$0xff] }
  0x96   :  { %v257_v13 = vld [vmem:[#allocation5 + $0x3b8] sm:$0xff] }
  0x9b   :  { %1600 = vmatmul.mubr.bf16.vlgmr.msra.gmra.mrb[0].mxu1 %v3042_v23  ;;  %2297 = vmatmul.mubr.bf16.vlgmr.msra.gmra.mrb[0].mxu0 %v3076_v28  ;;  %v200_v23 = vld [vmem:[#allocation5 + $0x1f0] sm:$0xff]  ;;  %v219_v28 = vld [vmem:[#allocation5 + $0x288] sm:$0xff] }
  0x9c   :  { %1609 = vmatpush1.bf16.xpose.msra.mxu1 %v3116_v27  ;;  %2306 = vmatpush1.bf16.xpose.msra.mxu0 %v3150_v31  ;;  %v3157_v27 = vcombine.high %v164_v22, %v200_v23  ;;  %v3048_v31 = vcombine.low %v74_v9, %v110_v10  ;;  %v3156_v39 = vcombine.low %v164_v22, %v200_v23  ;;  %v130_v22 = vld [vmem:[#allocation2 + $0x200] sm:$0xff] }
  0x9d   :  { %1610 = vmatprep.subr.bf16.mxu1 %v3189_v32  ;;  %2307 = vmatprep.subr.bf16.mxu0 %v3223_v33  ;;  %v272_v32 = vld [vmem:[#allocation5 + $0x430] sm:$0xff]  ;;  %v75_v33 = vld [vmem:[#allocation2 + $0x48] sm:$0xff]  ;;  %v3194_v48 = vcombine.low %v219_v28, %v255_v29  ;;  %v3127_v10 = vcombine.high %v149_v4, %v185_v5 }
  0x9e   :  { %1640 = vmatprep.mubr.bf16.mxu1 %v3045_v34  ;;  %2337 = vmatprep.mubr.bf16.mxu0 %v3079_v35  ;;  %v111_v34 = vld [vmem:[#allocation2 + $0x168] sm:$0xff]  ;;  %v3122_v35 = vcombine.low %v147_v20, %v183_v21  ;;  %v3228_v49 = vcombine.low %v236_v30, %v272_v32  ;;  %v3086_v20 = vcombine.low %v93_v61, %v129_v62  ;;  %v94_v21 = vld [vmem:[#allocation2 + $0xe0] sm:$0xff] }
  0xa4   :  { %1611 = vmatpush1.bf16.xpose.msra.mxu1 %v3188_v40  ;;  %2308 = vmatpush1.bf16.xpose.msra.mxu0 %v3222_v41  ;;  %v3195_v40 = vcombine.high %v219_v28, %v255_v29  ;;  %v3229_v41 = vcombine.high %v236_v30, %v272_v32  ;;  %v150_v28 = vld [vmem:[#allocation5 + $0x60] sm:$0xff]  ;;  %v167_v30 = vld [vmem:[#allocation5 + $0xe8] sm:$0xff] }
  0xa5   :  { %1649 = vmatprep.subr.bf16.mxu1 %v3119_v42  ;;  %2346 = vmatprep.subr.bf16.mxu0 %v3153_v43  ;;  %v3051_v42 = vcombine.high %v75_v33, %v111_v34  ;;  %v3085_v43 = vcombine.high %v92_v37, %v128_v38  ;;  %v186_v29 = vld [vmem:[#allocation5 + $0x180] sm:$0xff]  ;;  %v239_v38 = vld [vmem:[#allocation5 + $0x328] sm:$0xff] }
  0xa6   :  { %v258_v37 = vld [vmem:[#allocation5 + $0x3c0] sm:$0xff] }
  0xab   :  { %1641 = vmatmul.mubr.bf16.vlgmr.msra.gmra.mrb[0].mxu1 %v3044_v47  ;;  %2338 = vmatmul.mubr.bf16.vlgmr.msra.gmra.mrb[0].mxu0 %v3078_v52  ;;  %v201_v47 = vld [vmem:[#allocation5 + $0x1f8] sm:$0xff]  ;;  %v220_v52 = vld [vmem:[#allocation5 + $0x290] sm:$0xff] }
  0xac   :  { %1650 = vmatpush1.bf16.xpose.msra.mxu1 %v3118_v51  ;;  %2347 = vmatpush1.bf16.xpose.msra.mxu0 %v3152_v55  ;;  %v3159_v51 = vcombine.high %v165_v46, %v201_v47  ;;  %v3050_v55 = vcombine.low %v75_v33, %v111_v34  ;;  %v3158_v63 = vcombine.low %v165_v46, %v201_v47  ;;  %v131_v46 = vld [vmem:[#allocation2 + $0x208] sm:$0xff] }
  0xad   :  { %1651 = vmatprep.subr.bf16.mxu1 %v3191_v56  ;;  %2348 = vmatprep.subr.bf16.mxu0 %v3225_v57  ;;  %v273_v56 = vld [vmem:[#allocation5 + $0x438] sm:$0xff]  ;;  %v76_v57 = vld [vmem:[#allocation2 + $0x50] sm:$0xff]  ;;  %v3196_v8 = vcombine.low %v220_v52, %v256_v53  ;;  %v3129_v34 = vcombine.high %v150_v28, %v186_v29 }
  0xae   :  { %1681 = vmatprep.mubr.bf16.mxu1 %v3047_v58  ;;  %2378 = vmatprep.mubr.bf16.mxu0 %v3081_v59  ;;  %v112_v58 = vld [vmem:[#allocation2 + $0x170] sm:$0xff]  ;;  %v3124_v59 = vcombine.low %v148_v44, %v184_v45  ;;  %v3230_v9 = vcombine.low %v237_v54, %v273_v56  ;;  %v3088_v44 = vcombine.low %v94_v21, %v130_v22  ;;  %v95_v45 = vld [vmem:[#allocation2 + $0xe8] sm:$0xff] }
  0xb4   :  { %1652 = vmatpush1.bf16.xpose.msra.mxu1 %v3190_v0  ;;  %2349 = vmatpush1.bf16.xpose.msra.mxu0 %v3224_v1  ;;  %v3197_v0 = vcombine.high %v220_v52, %v256_v53  ;;  %v3231_v1 = vcombine.high %v237_v54, %v273_v56  ;;  %v151_v52 = vld [vmem:[#allocation5 + $0x68] sm:$0xff]  ;;  %v168_v54 = vld [vmem:[#allocation5 + $0xf0] sm:$0xff] }
  0xb5   :  { %1690 = vmatprep.subr.bf16.mxu1 %v3121_v2  ;;  %2387 = vmatprep.subr.bf16.mxu0 %v3155_v3  ;;  %v3053_v2 = vcombine.high %v76_v57, %v112_v58  ;;  %v3087_v3 = vcombine.high %v93_v61, %v129_v62  ;;  %v187_v53 = vld [vmem:[#allocation5 + $0x188] sm:$0xff]  ;;  %v240_v62 = vld [vmem:[#allocation5 + $0x330] sm:$0xff] }
  0xb6   :  { %v259_v61 = vld [vmem:[#allocation5 + $0x3c8] sm:$0xff] }
  0xbb   :  { %1682 = vmatmul.mubr.bf16.vlgmr.msra.gmra.mrb[0].mxu1 %v3046_v7  ;;  %2379 = vmatmul.mubr.bf16.vlgmr.msra.gmra.mrb[0].mxu0 %v3080_v12  ;;  %v202_v7 = vld [vmem:[#allocation5 + $0x200] sm:$0xff]  ;;  %v221_v12 = vld [vmem:[#allocation5 + $0x298] sm:$0xff] }
  0xbc   :  { %1691 = vmatpush1.bf16.xpose.msra.mxu1 %v3120_v11  ;;  %2388 = vmatpush1.bf16.xpose.msra.mxu0 %v3154_v15  ;;  %v3161_v11 = vcombine.high %v166_v6, %v202_v7  ;;  %v3052_v15 = vcombine.low %v76_v57, %v112_v58  ;;  %v3160_v23 = vcombine.low %v166_v6, %v202_v7  ;;  %v132_v6 = vld [vmem:[#allocation2 + $0x210] sm:$0xff] }
  0xbd   :  { %1692 = vmatprep.subr.bf16.mxu1 %v3193_v16  ;;  %2389 = vmatprep.subr.bf16.mxu0 %v3227_v17  ;;  %v274_v16 = vld [vmem:[#allocation5 + $0x440] sm:$0xff]  ;;  %v77_v17 = vld [vmem:[#allocation2 + $0x58] sm:$0xff]  ;;  %v3198_v32 = vcombine.low %v221_v12, %v257_v13  ;;  %v3131_v58 = vcombine.high %v151_v52, %v187_v53 }
  0xbe   :  { %1722 = vmatprep.mubr.bf16.mxu1 %v3049_v18  ;;  %2419 = vmatprep.mubr.bf16.mxu0 %v3083_v19  ;;  %v113_v18 = vld [vmem:[#allocation2 + $0x178] sm:$0xff]  ;;  %v3126_v19 = vcombine.low %v149_v4, %v185_v5  ;;  %v3232_v33 = vcombine.low %v238_v14, %v274_v16  ;;  %v3090_v4 = vcombine.low %v95_v45, %v131_v46  ;;  %v96_v5 = vld [vmem:[#allocation2 + $0xf0] sm:$0xff] }
  0xc4   :  { %1693 = vmatpush1.bf16.xpose.msra.mxu1 %v3192_v24  ;;  %2390 = vmatpush1.bf16.xpose.msra.mxu0 %v3226_v25  ;;  %v3199_v24 = vcombine.high %v221_v12, %v257_v13  ;;  %v3233_v25 = vcombine.high %v238_v14, %v274_v16  ;;  %v152_v12 = vld [vmem:[#allocation5 + $0x70] sm:$0xff]  ;;  %v169_v14 = vld [vmem:[#allocation5 + $0xf8] sm:$0xff] }
  0xc5   :  { %1731 = vmatprep.subr.bf16.mxu1 %v3123_v26  ;;  %2428 = vmatprep.subr.bf16.mxu0 %v3157_v27  ;;  %v3055_v26 = vcombine.high %v77_v17, %v113_v18  ;;  %v3089_v27 = vcombine.high %v94_v21, %v130_v22  ;;  %v188_v13 = vld [vmem:[#allocation5 + $0x190] sm:$0xff]  ;;  %v241_v22 = vld [vmem:[#allocation5 + $0x338] sm:$0xff] }
  0xc6   :  { %v260_v21 = vld [vmem:[#allocation5 + $0x3d0] sm:$0xff] }
  0xcb   :  { %1723 = vmatmul.mubr.bf16.vlgmr.msra.gmra.mrb[0].mxu1 %v3048_v31  ;;  %2420 = vmatmul.mubr.bf16.vlgmr.msra.gmra.mrb[0].mxu0 %v3082_v36  ;;  %v203_v31 = vld [vmem:[#allocation5 + $0x208] sm:$0xff]  ;;  %v222_v36 = vld [vmem:[#allocation5 + $0x2a0] sm:$0xff] }
  0xcc   :  { %1732 = vmatpush1.bf16.xpose.msra.mxu1 %v3122_v35  ;;  %2429 = vmatpush1.bf16.xpose.msra.mxu0 %v3156_v39  ;;  %v3163_v35 = vcombine.high %v167_v30, %v203_v31  ;;  %v3054_v39 = vcombine.low %v77_v17, %v113_v18  ;;  %v3162_v47 = vcombine.low %v167_v30, %v203_v31  ;;  %v133_v30 = vld [vmem:[#allocation2 + $0x218] sm:$0xff] }
  0xcd   :  { %1733 = vmatprep.subr.bf16.mxu1 %v3195_v40  ;;  %2430 = vmatprep.subr.bf16.mxu0 %v3229_v41  ;;  %v275_v40 = vld [vmem:[#allocation5 + $0x448] sm:$0xff]  ;;  %v78_v41 = vld [vmem:[#allocation2 + $0x60] sm:$0xff]  ;;  %v3200_v56 = vcombine.low %v222_v36, %v258_v37  ;;  %v3133_v18 = vcombine.high %v152_v12, %v188_v13 }
  0xce   :  { %1763 = vmatprep.mubr.bf16.mxu1 %v3051_v42  ;;  %2460 = vmatprep.mubr.bf16.mxu0 %v3085_v43  ;;  %v114_v42 = vld [vmem:[#allocation2 + $0x180] sm:$0xff]  ;;  %v3128_v43 = vcombine.low %v150_v28, %v186_v29  ;;  %v3234_v57 = vcombine.low %v239_v38, %v275_v40  ;;  %v3092_v28 = vcombine.low %v96_v5, %v132_v6  ;;  %v97_v29 = vld [vmem:[#allocation2 + $0xf8] sm:$0xff] }
  0xd4   :  { %1734 = vmatpush1.bf16.xpose.msra.mxu1 %v3194_v48  ;;  %2431 = vmatpush1.bf16.xpose.msra.mxu0 %v3228_v49  ;;  %v3201_v48 = vcombine.high %v222_v36, %v258_v37  ;;  %v3235_v49 = vcombine.high %v239_v38, %v275_v40  ;;  %v153_v36 = vld [vmem:[#allocation5 + $0x78] sm:$0xff]  ;;  %v170_v38 = vld [vmem:[#allocation5 + $0x100] sm:$0xff] }
  0xd5   :  { %1772 = vmatprep.subr.bf16.mxu1 %v3125_v50  ;;  %2469 = vmatprep.subr.bf16.mxu0 %v3159_v51  ;;  %v3057_v50 = vcombine.high %v78_v41, %v114_v42  ;;  %v3091_v51 = vcombine.high %v95_v45, %v131_v46  ;;  %v189_v37 = vld [vmem:[#allocation5 + $0x198] sm:$0xff]  ;;  %v242_v46 = vld [vmem:[#allocation5 + $0x340] sm:$0xff] }
  0xd6   :  { %v261_v45 = vld [vmem:[#allocation5 + $0x3d8] sm:$0xff] }
  0xdb   :  { %1764 = vmatmul.mubr.bf16.vlgmr.msra.gmra.mrb[0].mxu1 %v3050_v55  ;;  %2461 = vmatmul.mubr.bf16.vlgmr.msra.gmra.mrb[0].mxu0 %v3084_v60  ;;  %v204_v55 = vld [vmem:[#allocation5 + $0x210] sm:$0xff]  ;;  %v223_v60 = vld [vmem:[#allocation5 + $0x2a8] sm:$0xff] }
  0xdc   :  { %1773 = vmatpush1.bf16.xpose.msra.mxu1 %v3124_v59  ;;  %2470 = vmatpush1.bf16.xpose.msra.mxu0 %v3158_v63  ;;  %v3165_v59 = vcombine.high %v168_v54, %v204_v55  ;;  %v3056_v63 = vcombine.low %v78_v41, %v114_v42  ;;  %v3164_v7 = vcombine.low %v168_v54, %v204_v55  ;;  %v134_v54 = vld [vmem:[#allocation2 + $0x220] sm:$0xff] }
  0xdd   :  { %1774 = vmatprep.subr.bf16.mxu1 %v3197_v0  ;;  %2471 = vmatprep.subr.bf16.mxu0 %v3231_v1  ;;  %v276_v0 = vld [vmem:[#allocation5 + $0x450] sm:$0xff]  ;;  %v79_v1 = vld [vmem:[#allocation2 + $0x68] sm:$0xff]  ;;  %v3202_v16 = vcombine.low %v223_v60, %v259_v61  ;;  %v3135_v42 = vcombine.high %v153_v36, %v189_v37 }
  0xde   :  { %1804 = vmatprep.mubr.bf16.mxu1 %v3053_v2  ;;  %2501 = vmatprep.mubr.bf16.mxu0 %v3087_v3  ;;  %v115_v2 = vld [vmem:[#allocation2 + $0x188] sm:$0xff]  ;;  %v3130_v3 = vcombine.low %v151_v52, %v187_v53  ;;  %v3236_v17 = vcombine.low %v240_v62, %v276_v0  ;;  %v3094_v52 = vcombine.low %v97_v29, %v133_v30  ;;  %v98_v53 = vld [vmem:[#allocation2 + $0x100] sm:$0xff] }
  0xe4   :  { %1775 = vmatpush1.bf16.xpose.msra.mxu1 %v3196_v8  ;;  %2472 = vmatpush1.bf16.xpose.msra.mxu0 %v3230_v9  ;;  %v3203_v8 = vcombine.high %v223_v60, %v259_v61  ;;  %v3237_v9 = vcombine.high %v240_v62, %v276_v0  ;;  %v154_v60 = vld [vmem:[#allocation5 + $0x80] sm:$0xff]  ;;  %v171_v62 = vld [vmem:[#allocation5 + $0x108] sm:$0xff] }
  0xe5   :  { %1813 = vmatprep.subr.bf16.mxu1 %v3127_v10  ;;  %2510 = vmatprep.subr.bf16.mxu0 %v3161_v11  ;;  %v3059_v10 = vcombine.high %v79_v1, %v115_v2  ;;  %v3093_v11 = vcombine.high %v96_v5, %v132_v6  ;;  %v190_v61 = vld [vmem:[#allocation5 + $0x1a0] sm:$0xff]  ;;  %v243_v6 = vld [vmem:[#allocation5 + $0x348] sm:$0xff] }
  0xe6   :  { %v262_v5 = vld [vmem:[#allocation5 + $0x3e0] sm:$0xff] }
  0xeb   :  { %1805 = vmatmul.mubr.bf16.vlgmr.msra.gmra.mrb[0].mxu1 %v3052_v15  ;;  %2502 = vmatmul.mubr.bf16.vlgmr.msra.gmra.mrb[0].mxu0 %v3086_v20  ;;  %v205_v15 = vld [vmem:[#allocation5 + $0x218] sm:$0xff]  ;;  %v224_v20 = vld [vmem:[#allocation5 + $0x2b0] sm:$0xff] }
  0xec   :  { %1814 = vmatpush1.bf16.xpose.msra.mxu1 %v3126_v19  ;;  %2511 = vmatpush1.bf16.xpose.msra.mxu0 %v3160_v23  ;;  %v3167_v19 = vcombine.high %v169_v14, %v205_v15  ;;  %v3058_v23 = vcombine.low %v79_v1, %v115_v2  ;;  %v3166_v31 = vcombine.low %v169_v14, %v205_v15  ;;  %v135_v14 = vld [vmem:[#allocation2 + $0x228] sm:$0xff] }
  0xed   :  { %1815 = vmatprep.subr.bf16.mxu1 %v3199_v24  ;;  %2512 = vmatprep.subr.bf16.mxu0 %v3233_v25  ;;  %v277_v24 = vld [vmem:[#allocation5 + $0x458] sm:$0xff]  ;;  %v80_v25 = vld [vmem:[#allocation2 + $0x70] sm:$0xff]  ;;  %v3204_v40 = vcombine.low %v224_v20, %v260_v21  ;;  %v3137_v2 = vcombine.high %v154_v60, %v190_v61 }
  0xee   :  { %1845 = vmatprep.mubr.bf16.mxu1 %v3055_v26  ;;  %2542 = vmatprep.mubr.bf16.mxu0 %v3089_v27  ;;  %v116_v26 = vld [vmem:[#allocation2 + $0x190] sm:$0xff]  ;;  %v3132_v27 = vcombine.low %v152_v12, %v188_v13  ;;  %v3238_v41 = vcombine.low %v241_v22, %v277_v24  ;;  %v3096_v12 = vcombine.low %v98_v53, %v134_v54  ;;  %v99_v13 = vld [vmem:[#allocation2 + $0x108] sm:$0xff] }
  0xf4   :  { %1816 = vmatpush1.bf16.xpose.msra.mxu1 %v3198_v32  ;;  %2513 = vmatpush1.bf16.xpose.msra.mxu0 %v3232_v33  ;;  %v3205_v32 = vcombine.high %v224_v20, %v260_v21  ;;  %v3239_v33 = vcombine.high %v241_v22, %v277_v24  ;;  %v172_v20 = vld [vmem:[#allocation5 + $0x110] sm:$0xff] }
  0xf5   :  { %1854 = vmatprep.subr.bf16.mxu1 %v3129_v34  ;;  %2551 = vmatprep.subr.bf16.mxu0 %v3163_v35  ;;  %v3061_v34 = vcombine.high %v80_v25, %v116_v26  ;;  %v3095_v35 = vcombine.high %v97_v29, %v133_v30  ;;  %v208_v21 = vld [vmem:[#allocation5 + $0x230] sm:$0xff]  ;;  %v3098_v30 = vcombine.low %v99_v13, %v135_v14 }
  0xf6   :  { %v3173_v24 = vcombine.high %v172_v20, %v208_v21  ;;  %v280_v29 = vld [vmem:[#allocation5 + $0x470] sm:$0xff] }
  0xfb   :  { %1846 = vmatmul.mubr.bf16.vlgmr.msra.gmra.mrb[0].mxu1 %v3054_v39  ;;  %2543 = vmatmul.mubr.bf16.vlgmr.msra.gmra.mrb[0].mxu0 %v3088_v44  ;;  %v206_v39 = vld [vmem:[#allocation5 + $0x220] sm:$0xff]  ;;  %v225_v44 = vld [vmem:[#allocation5 + $0x2b8] sm:$0xff] }
  0xfc   :  { %1855 = vmatpush1.bf16.xpose.msra.mxu1 %v3128_v43  ;;  %2552 = vmatpush1.bf16.xpose.msra.mxu0 %v3162_v47  ;;  %v3169_v43 = vcombine.high %v170_v38, %v206_v39  ;;  %v3060_v47 = vcombine.low %v80_v25, %v116_v26  ;;  %v3168_v55 = vcombine.low %v170_v38, %v206_v39  ;;  %v100_v25 = vld [vmem:[#allocation2 + $0x110] sm:$0xff]  ;;  %v101_v38 = vld [vmem:[#allocation2 + $0x118] sm:$0xff] }
  0xfd   :  { %1856 = vmatprep.subr.bf16.mxu1 %v3201_v48  ;;  %2553 = vmatprep.subr.bf16.mxu0 %v3235_v49  ;;  %v278_v48 = vld [vmem:[#allocation5 + $0x460] sm:$0xff]  ;;  %v81_v49 = vld [vmem:[#allocation2 + $0x78] sm:$0xff]  ;;  %v3206_v0 = vcombine.low %v225_v44, %v261_v45  ;;  %v136_v26 = vld [vmem:[#allocation2 + $0x230] sm:$0xff] }
  0xfe   :  { %1886 = vmatprep.mubr.bf16.mxu1 %v3057_v50  ;;  %2583 = vmatprep.mubr.bf16.mxu0 %v3091_v51  ;;  %v117_v50 = vld [vmem:[#allocation2 + $0x198] sm:$0xff]  ;;  %v3134_v51 = vcombine.low %v153_v36, %v189_v37  ;;  %v3240_v1 = vcombine.low %v242_v46, %v278_v48 }
  0xff   :  { %v137_v39 = vld [vmem:[#allocation2 + $0x238] sm:$0xff] }
 0x104   :  { %1857 = vmatpush1.bf16.xpose.msra.mxu1 %v3200_v56  ;;  %2554 = vmatpush1.bf16.xpose.msra.mxu0 %v3234_v57  ;;  %v3207_v56 = vcombine.high %v225_v44, %v261_v45  ;;  %v3241_v57 = vcombine.high %v242_v46, %v278_v48  ;;  %v3103_v44 = vcombine.high %v101_v38, %v137_v39  ;;  %v3428_v48 = vld [vmem:[#allocation7] sm:$0xff]  }
 0x105   :  { %1895 = vmatprep.subr.bf16.mxu1 %v3131_v58  ;;  %2592 = vmatprep.subr.bf16.mxu0 %v3165_v59  ;;  %v3063_v58 = vcombine.high %v81_v49, %v117_v50  ;;  %v3097_v59 = vcombine.high %v98_v53, %v134_v54 }
 0x10b   :  { %1887 = vmatmul.mubr.bf16.vlgmr.msra.gmra.mrb[0].mxu1 %v3056_v63  ;;  %2584 = vmatmul.mubr.bf16.vlgmr.msra.gmra.mrb[0].mxu0 %v3090_v4  ;;  %v207_v63 = vld [vmem:[#allocation5 + $0x228] sm:$0xff]  ;;  %v226_v4 = vld [vmem:[#allocation5 + $0x2c0] sm:$0xff] }
 0x10c   :  { %1896 = vmatpush1.bf16.xpose.msra.mxu1 %v3130_v3  ;;  %2593 = vmatpush1.bf16.xpose.msra.mxu0 %v3164_v7  ;;  %v3171_v3 = vcombine.high %v171_v62, %v207_v63  ;;  %v3062_v7 = vcombine.low %v81_v49, %v117_v50  ;;  %v3170_v15 = vcombine.low %v171_v62, %v207_v63  ;;  %v3535_v49 = vmov 0.0   ;;  %v3429_v50 = vld [vmem:[#allocation7 + $0x8] sm:$0xff]  }
 0x10d   :  { %1897 = vmatprep.subr.bf16.mxu1 %v3203_v8  ;;  %2594 = vmatprep.subr.bf16.mxu0 %v3237_v9  ;;  %v279_v8 = vld [vmem:[#allocation5 + $0x468] sm:$0xff]  ;;  %v82_v9 = vld [vmem:[#allocation2 + $0x80] sm:$0xff]  ;;  %v3208_v22 = vcombine.low %v226_v4, %v262_v5 }
 0x10e   :  { %1927 = vmatprep.mubr.bf16.mxu1 %v3059_v10  ;;  %2624 = vmatprep.mubr.bf16.mxu0 %v3093_v11  ;;  %v118_v10 = vld [vmem:[#allocation2 + $0x1a0] sm:$0xff]  ;;  %v3136_v11 = vcombine.low %v154_v60, %v190_v61 }
 0x114   :  { %1898 = vmatpush1.bf16.xpose.msra.mxu1 %v3202_v16  ;;  %2595 = vmatpush1.bf16.xpose.msra.mxu0 %v3236_v17  ;;  %v3209_v16 = vcombine.high %v226_v4, %v262_v5  ;;  %v3243_v17 = vcombine.high %v243_v6, %v279_v8 }
 0x115   :  { %1936 = vmatprep.subr.bf16.mxu1 %v3133_v18  ;;  %2633 = vmatprep.subr.bf16.mxu0 %v3167_v19  ;;  %v3065_v18 = vcombine.high %v82_v9, %v118_v10  ;;  %v3099_v19 = vcombine.high %v99_v13, %v135_v14 }
 0x11b   :  { %1928 = vmatmul.mubr.bf16.vlgmr.msra.gmra.mrb[0].mxu1 %v3058_v23  ;;  %2625 = vmatmul.mubr.bf16.vlgmr.msra.gmra.mrb[0].mxu0 %v3092_v28  ;;  %v3242_v23 = vcombine.low %v243_v6, %v279_v8  ;;  %v244_v28 = vld [vmem:[#allocation5 + $0x350] sm:$0xff] }
 0x11c   :  { %1937 = vmatpush1.bf16.xpose.msra.mxu1 %v3132_v27  ;;  %2634 = vmatpush1.bf16.xpose.msra.mxu0 %v3166_v31  ;;  %v3064_v27 = vcombine.low %v82_v9, %v118_v10  ;;  %v3172_v31 = vcombine.low %v172_v20, %v208_v21  ;;  %v3244_v36 = vcombine.low %v244_v28, %v280_v29 }
 0x11d   :  { %1938 = vmatprep.subr.bf16.mxu1 %v3205_v32  ;;  %2635 = vmatprep.subr.bf16.mxu0 %v3239_v33  ;;  %v3101_v32 = vcombine.high %v100_v25, %v136_v26  ;;  %v3245_v33 = vcombine.high %v244_v28, %v280_v29 }
 0x11e   :  { %1968 = vmatprep.mubr.bf16.mxu1 %v3061_v34  ;;  %2665 = vmatprep.mubr.bf16.mxu0 %v3095_v35  ;;  %v173_v34 = vld [vmem:[#allocation5 + $0x118] sm:$0xff] }
 0x11f   :  { %v209_v35 = vld [vmem:[#allocation5 + $0x238] sm:$0xff] }
 0x120   :  { %v3175_v37 = vcombine.high %v173_v34, %v209_v35 }
 0x124   :  { %1939 = vmatpush1.bf16.xpose.msra.mxu1 %v3204_v40  ;;  %2636 = vmatpush1.bf16.xpose.msra.mxu0 %v3238_v41  ;;  %v245_v40 = vld [vmem:[#allocation5 + $0x358] sm:$0xff] }
 0x125   :  { %1977 = vmatprep.subr.bf16.mxu1 %v3135_v42  ;;  %2674 = vmatprep.subr.bf16.mxu0 %v3169_v43  ;;  %v281_v41 = vld [vmem:[#allocation5 + $0x478] sm:$0xff]  ;;  %v3100_v42 = vcombine.low %v100_v25, %v136_v26  ;;  %v3174_v43 = vcombine.low %v173_v34, %v209_v35  ;;  %v3252_v35 = vld [vmem:[%s3654_s4] ss:$0 sm:$0xff] }
 0x126   :  { %v3247_v45 = vcombine.high %v245_v40, %v281_v41  ;;  %v3246_v46 = vcombine.low %v245_v40, %v281_v41 }
 0x12b   :  { %1969 = vmatmul.mubr.bf16.vlgmr.msra.gmra.mrb[0].mxu1 %v3060_v47  ;;  %2666 = vmatmul.mubr.bf16.vlgmr.msra.gmra.mrb[0].mxu0 %v3094_v52  ;;  %v3102_v47 = vcombine.low %v101_v38, %v137_v39 }
 0x12c   :  { %1978 = vmatpush1.bf16.xpose.msra.mxu1 %v3134_v51  ;;  %2675 = vmatpush1.bf16.xpose.msra.mxu0 %v3168_v55 }
 0x12d   :  { %1979 = vmatprep.subr.bf16.mxu1 %v3207_v56  ;;  %2676 = vmatprep.subr.bf16.mxu0 %v3241_v57 }
 0x12e   :  { %2009 = vmatprep.mubr.bf16.mxu1 %v3063_v58  ;;  %2706 = vmatprep.mubr.bf16.mxu0 %v3097_v59 }
 0x134   :  { %1980 = vmatpush1.bf16.xpose.msra.mxu1 %v3206_v0  ;;  %2677 = vmatpush1.bf16.xpose.msra.mxu0 %v3240_v1  ;;  %v3430_v0 = vld [vmem:[%s3655_s5] sm:$0xff]   ;;  %v3431_v1 = vld [vmem:[%s3655_s5 + $0x8] sm:$0xff]  }
 0x135   :  { %2018 = vmatprep.subr.bf16.mxu1 %v3137_v2  ;;  %2715 = vmatprep.subr.bf16.mxu0 %v3171_v3 }
 0x13b   :  { %2010 = vmatmul.mubr.bf16.vlgmr.msra.gmra.mrb[0].mxu1 %v3062_v7  ;;  %2707 = vmatmul.mubr.bf16.vlgmr.msra.gmra.mrb[0].mxu0 %v3096_v12 }
 0x13c   :  { %2019 = vmatpush1.bf16.xpose.msra.mxu1 %v3136_v11  ;;  %2716 = vmatpush1.bf16.xpose.msra.mxu0 %v3170_v15 }
 0x13d   :  { %2020 = vmatprep.subr.bf16.mxu1 %v3209_v16  ;;  %2717 = vmatprep.subr.bf16.mxu0 %v3243_v17 }
 0x13e   :  { %2050 = vmatprep.mubr.bf16.mxu1 %v3065_v18  ;;  %2747 = vmatprep.mubr.bf16.mxu0 %v3099_v19 }
 0x144   :  { %2021 = vmatpush1.bf16.xpose.msra.mxu1 %v3208_v22  ;;  %2718 = vmatpush1.bf16.xpose.msra.mxu0 %v3242_v23 }
 0x145   :  { %2756 = vmatprep.subr.bf16.mxu0 %v3173_v24  ;;  %3262 = vmatprep.subr.bf16.mxu1 %v3535_v49 }
 0x14b   :  { %2051 = vmatmul.mubr.bf16.vlgmr.msra.gmra.mrb[0].mxu1 %v3064_v27  ;;  %2748 = vmatmul.mubr.bf16.vlgmr.msra.gmra.mrb[0].mxu0 %v3098_v30 }
 0x14c   :  { %2757 = vmatpush1.bf16.xpose.msra.mxu0 %v3172_v31  ;;  %2788 = vmatprep.mubr.bf16.mxu0 %v3101_v32  ;;  %v3251_v32 = vld [vmem:[%s3653_s3] ss:$0 sm:$0xff]  ;;  %s3500_s3 = scalar_lea.vmem %s3020_s18, 256 }
 0x14d   :  { %2758 = vmatprep.subr.bf16.mxu0 %v3245_v33  ;;  %3263 = vmatpush3.bf16.msra.mxu1 %v3428_v48  ;;  %p3501_p10 = scmp.ne.s32.totalorder %s3020_s18, %s3500_s3  ;;  %p3506_p12 = scmp.lt.s32.totalorder %s3500_s3, %s3500_s3 }
 0x14e   :  { %3264 = vmatprep.subr.bf16.mxu1 %v3535_v49  ;;  %3266 = vmatprep.mubr.msk.bf16.mxu1 %vm3536_vm0, %v3535_v49 }
 0x14f   :  { %p3507_p13 = por %p3506_p12, %p3505_p11 }
 0x151   :  { %3265 = vmatpush3.bf16.msra.mxu1 %v3429_v50  ;;  %p3508_p0 = pnand %p3507_p13, %p3501_p10 }
 0x152   :  { %3270 = vmatprep.subr.bf16.mxu1 %v3535_v49 }
 0x154   :  { %2759 = vmatpush1.bf16.xpose.msra.mxu0 %v3244_v36 }
 0x155   :  { %2797 = vmatprep.subr.bf16.mxu0 %v3175_v37 }
 0x15b   :  { %2789 = vmatmul.mubr.bf16.vlgmr.msra.gmra.mrb[0].mxu0 %v3100_v42 }
 0x15c   :  { %2798 = vmatpush1.bf16.xpose.msra.mxu0 %v3174_v43  ;;  %2829 = vmatprep.mubr.bf16.mxu0 %v3103_v44 }
 0x15d   :  { %2799 = vmatprep.subr.bf16.mxu0 %v3247_v45 }
 0x164   :  { %2800 = vmatpush1.bf16.xpose.msra.mxu0 %v3246_v46 }
 0x16b   :  { %2830 = vmatmul.mubr.bf16.vlgmr.msra.gmra.mrb[0].mxu0 %v3102_v47 }
 0x21e   :  { %v2052_v51 = vpop.f32.mrb[0].mxu1 }
 0x21f   :  { %v2054_v52 = vpop.f32.mrb[1].mxu1 }
 0x220   :  { %v2055_v53 = vpop.f32.mrb[2].mxu1 }
 0x221   :  { %v2057_v54 = vpop.f32.mrb[3].mxu1 }
 0x23e   :  { %v2831_v55 = vpop.f32.mrb[0].mxu0 }
 0x23f   :  { %v3278_v56 = vadd.f32 %v2831_v55, %v2052_v51  ;;  %v2833_v57 = vpop.f32.mrb[1].mxu0 }
 0x240   :  { %v2834_v58 = vpop.f32.mrb[2].mxu0 }
 0x241   :  { %v3279_v59 = vadd.f32 %v2834_v58, %v2055_v53  ;;  %v2836_v60 = vpop.f32.mrb[3].mxu0  ;;  %v2838_v61 = vmax.f32 %v3278_v56, 0.0 }
 0x243   :  { %v2839_v62 = vmax.f32 %v3279_v59, 0.0 }
 0x245   :  { %v2840_v63 = vpack.c.bf16 %v2839_v62, %v2838_v61 }
 0x247   :  { %3267 = vmatmul.mubr.msk.bf16.vlgmr.msra.gmra.mrb[4].mxu1 %vm2857_vm1, %v2840_v63 }
 0x248   :  { %3274 = vmatprep.mubr.msk.bf16.mxu1 %vm3536_vm0, %v3535_v49  ;;  %3271 = vmatpush3.bf16.msra.mxu1 %v3430_v0 }
 0x249   :  { %3272 = vmatprep.subr.bf16.mxu1 %v3535_v49 }
 0x24c   :  { %3273 = vmatpush3.bf16.msra.mxu1 %v3431_v1 }
 0x31a   :  { %v2895_v2 = vpop.f32.mrb[4].mxu1 }
 0x31b   :  { %v3268_v3 = vpop.f32.mrb[5].mxu1  ;;  %v2902_v5 = vsel %vm2857_vm1, %v2895_v2, 0.0 }
 0x31c   :  { %v2898_v4 = vpop.f32.mrb[6].mxu1 }
 0x31d   :  { %v2903_v6 = vsel %vm2857_vm1, %v2898_v4, 0.0  ;;  %v3269_v7 = vpop.f32.mrb[7].mxu1 }
 0x31e   :  { %v2904_v8 = vadd.f32 %v2903_v6, %v2902_v5 }
 0x320   :  { %v2905_v9 = vrot.slane %v2904_v8, 4 }
 0x322   :  { %v2906_v10 = vadd.f32 %v2905_v9, %v2904_v8 }
 0x324   :  { %v2907_v11 = vrot.slane %v2906_v10, 2 }
 0x326   :  { %v2908_v12 = vadd.f32 %v2907_v11, %v2906_v10 }
 0x328   :  { %v2909_v13 = vrot.slane %v2908_v12, 1 }
 0x32a   :  { %v2910_v14 = vadd.f32 %v2909_v13, %v2908_v12 }
 0x32c   :  { %v2912_v15 = vmul.f32 0.0625, %v2910_v14 }
 0x32e   :  { %v2913_v16 = vsub.f32 %v2895_v2, %v2912_v15  ;;  %v2914_v17 = vsub.f32 %v2898_v4, %v2912_v15 }
 0x330   :  { %v2915_v18 = vmul.f32 %v2913_v16, %v2913_v16  ;;  %v2916_v19 = vmul.f32 %v2914_v17, %v2914_v17 }
 0x332   :  { %v2917_v20 = vsel %vm2857_vm1, %v2915_v18, 0.0  ;;  %v2918_v21 = vsel %vm2857_vm1, %v2916_v19, 0.0 }
 0x333   :  { %v2919_v22 = vadd.f32 %v2918_v21, %v2917_v20 }
 0x335   :  { %v2920_v23 = vrot.slane %v2919_v22, 4 }
 0x337   :  { %v2921_v24 = vadd.f32 %v2920_v23, %v2919_v22 }
 0x339   :  { %v2922_v25 = vrot.slane %v2921_v24, 2 }
 0x33b   :  { %v2923_v26 = vadd.f32 %v2922_v25, %v2921_v24 }
 0x33d   :  { %v2924_v27 = vrot.slane %v2923_v26, 1 }
 0x33f   :  { %v2925_v28 = vadd.f32 %v2924_v27, %v2923_v26 }
 0x341   :  { %v2926_v29 = vmul.f32 0.0625, %v2925_v28 }
 0x343   :  { %v2927_v30 = vadd.f32 1e-05, %v2926_v29 }
 0x345   :  { %3432 = vrsqrt.f32 %v2927_v30 }
 0x34f   :  { %v3433_v31 = vpop.eup %3432 }
 0x350   :  { %v2929_v33 = vmul.f32 %v3433_v31, %v2913_v16  ;;  %v2930_v34 = vmul.f32 %v3433_v31, %v2914_v17 }
 0x352   :  { %v2938_v36 = vmul.f32 %v3251_v32, %v2929_v33  ;;  %v2939_v37 = vmul.f32 %v3251_v32, %v2930_v34 }
 0x354   :  { %v2947_v38 = vadd.f32 %v3252_v35, %v2938_v36  ;;  %v2948_v39 = vadd.f32 %v3252_v35, %v2939_v37 }
 0x356   :  { %v2949_v40 = vmax.f32 %v2947_v38, 0.0  ;;  %v2950_v41 = vmax.f32 %v2948_v39, 0.0 }
 0x358   :  { %v2951_v42 = vpack.c.bf16 %v2950_v41, %v2949_v40 }
 0x35a   :  { %3275 = vmatmul.mubr.msk.bf16.vlgmr.msra.gmra.mrb[8].mxu1 %vm2857_vm1, %v2951_v42 }
 0x42d   :  { %v3005_v43 = vpop.f32.mrb[8].mxu1 }
 0x42e   :  { %3012 = vst [vmem:[#allocation8] sm:$0xff] %v3005_v43  ;;  %v3276_v44 = vpop.f32.mrb[9].mxu1 }
 0x42f   :  { %v3008_v45 = vpop.f32.mrb[10].mxu1 }
 0x430   :  { %3013 = vst [vmem:[#allocation8 + $0x8] sm:$0xff] %v3008_v45  ;;  %v3277_v46 = vpop.f32.mrb[11].mxu1 }
 0x431   :  { %3511 = shalt.err (!%p3508_p0)
}
 0x432   :  { %s3512_s20 = scalar_lea.hbm %s3656_s6, 256 }
 0x433   :  { %p3513_p1 = scmp.ne.s32.totalorder %s3656_s6, %s3512_s20  ;;  %p3516_p2 = scmp.lt.u32.totalorder %s3512_s20, %s3656_s6 }
 0x435   :  { %p3518_p3 = pnand %p3516_p2, %p3513_p1 }
 0x437   :  { %3521 = shalt.err (!%p3518_p3)
}
 0x438   :  { %s3538_s25 = smov 128   ;;  %s3539_s26 = smov 8  }
 0x439   :  { %3025 = dma.vmem_to_hbm [thread:$0]  %s3020_s18, 256, %s3656_s6, [#allocation4], %s3538_s25, %s3538_s25, %s3539_s26  }
 0x43a   :  { %3526 = dma.done.wait [#allocation4], 256  }
 0x43b   :  { %3527 = vsyncadd [#allocation4], 4294967040 }
 0x43c   :  { %3029 = vsyncpa [#allocation3], 1 }
 0x43d   :  { %3030 = vsyncpa [#allocation6], 1 }
 0x43e   :  { %3031 = vsyncpa [#allocation4], 1 }

</bundles_post_ra>
